<compile_context>
chip_gen: v5e
topology: v5e:2x2
jax: 0.10.0
libtpu: 0.0.40
codegen_flags: <defaults>
</compile_context>

<pallas_src>
import math
import functools

import jax
import jax.numpy as jnp
from jax.experimental import pallas as pl
from jax.experimental.pallas import tpu as pltpu


_TM_CAP = 1024            # 512-1024-row tiles already hit ~85% of HBM roofline
_TN_MAX = 4096            # max output (lane) tile width
_VPU_K_MAX = 8            # K <= this -> always VPU broadcast MACs
_VPU_K_SMALL_TILE = 32    # K <= this AND tm <= _VPU_TM_SMALL -> VPU MACs too
_VPU_TM_SMALL = 64        # "small tile" threshold for the rule above


def _round_up(x, m):
    return ((x + m - 1) // m) * m


def _vmem_capacity_bytes():
    """Physical VMEM per core; conservative 64 MiB fallback (v7x-sized)."""
    try:
        info = pltpu.get_tpu_info()
        cap = getattr(info, "vmem_capacity_bytes", None)
        if cap:
            return int(cap)
    except Exception:
        pass
    return 64 * 1024 * 1024


def _matmul(x, w, use_vpu):
    """x: [tm, K], w: [K, tn] -> f32 [tm, tn].

    For tiny K (or tiny output tiles) the MXU operand is lane-sparse and pays
    weight-push + result-FIFO latency plus a relayout; K broadcast
    multiply-adds on the VPU are cheaper there and keep the MXU free.
    """
    if use_vpu:
        xf = x.astype(jnp.float32)
        wf = w.astype(jnp.float32)
        acc = xf[:, 0:1] * wf[0:1, :]
        for kk in range(1, x.shape[1]):
            acc = acc + xf[:, kk:kk + 1] * wf[kk:kk + 1, :]
        return acc
    return jnp.dot(x, w, preferred_element_type=jnp.float32)


def _random_layer_kernel(x0_ref, x1_ref, w0_ref, w1_ref, o_ref, *,
                         scale, use_vpu0, use_vpu1):
    # Fold the scale into the small [D0, tn] W0 tile (cheaper than scaling the
    # full [tm, tn] product every block).
    w0s = w0_ref[...] * jnp.asarray(scale, dtype=w0_ref.dtype)
    a = _matmul(x0_ref[...], w0s, use_vpu0)          # [tm, tn] f32
    b = _matmul(x1_ref[...], w1_ref[...], use_vpu1)  # [tm, tn] f32
    # out = (x0 @ (scale * W0)) * (x1 @ W1)
    o_ref[...] = (a * b).astype(o_ref.dtype)


def random_layer_pallas(x0, x1, w0, w1, output_dim, *, tm=None, tn=None,
                        out_dtype=jnp.float32):
    """Two-input RandomLayer forward.  x0:[B,D0], x1:[B,D1], w0:[D0,O], w1:[D1,O].

    For training-scale B prefer bf16 x0/x1/w0/w1 and out_dtype=jnp.bfloat16:
    the kernel is output-store-bound and bf16 halves HBM traffic.
    """
    # TODO(synk): generalize to arbitrary-length input_list (extra (x, W)
    # pairs) and/or batch many RandomLayer applications along a leading grid
    # axis / fuse with the producer-consumer op; at CDAN-demo sizes the wall
    # time is pure launch + DMA latency and only fusion/batching helps.
    B, D0 = x0.shape
    _, D1 = x1.shape
    O = w0.shape[1]
    assert w0.shape == (D0, O) and w1.shape == (D1, O) and x1.shape[0] == B
    assert O == output_dim

    num_inputs = 2
    scale = 1.0 / math.pow(float(output_dim), 1.0 / num_inputs)

    # ---- Generation-aware VMEM budget (v7x has 64 MiB, v5e/v6e have 128). ----
    vmem_cap = _vmem_capacity_bytes()
    small_vmem_part = vmem_cap <= 96 * 1024 * 1024        # v7x-class
    if small_vmem_part:
        vmem_budget = 36 * 1024 * 1024
        vmem_limit_cap = 48 * 1024 * 1024
    else:
        vmem_budget = 80 * 1024 * 1024
        vmem_limit_cap = 96 * 1024 * 1024

    bpe_x = jnp.dtype(x0.dtype).itemsize
    bpe_w = jnp.dtype(w0.dtype).itemsize
    bpe_out = jnp.dtype(out_dtype).itemsize

    # ---- Output (lane) tile.  Whole width when it fits (weights resident,
    # lane-dense stores); otherwise the 128-multiple tile <= _TN_MAX that
    # minimizes dead columns in the final partial block. ----
    if tn is None:
        if _round_up(O, 128) <= _TN_MAX:
            tn = O                          # full array dim -> no padding at all
        else:
            best_tn, best_pad = 128, None
            for cand in range(_TN_MAX, 0, -128):
                pad = pl.cdiv(O, cand) * cand - O
                if best_pad is None or pad < best_pad:
                    best_tn, best_pad = cand, pad
            tn = best_tn
    grid_n = pl.cdiv(O, tn)

    # ---- Batch (sublane) tile.  Working set per grid step:
    #   double-buffered x tiles + out tile, double-buffered resident W tiles,
    #   plus the two full-tile f32 dot intermediates (a, b). ----
    if tm is None:
        w_resident = 2 * bpe_w * (D0 + D1) * tn
        per_row = (2 * bpe_x * (D0 + D1)      # x0/x1 rows, double-buffered
                   + 2 * bpe_out * tn         # out row, double-buffered
                   + 2 * 4 * tn)              # a + b f32 intermediate rows
        tm_cap = max(8, ((vmem_budget - w_resident) // per_row) // 8 * 8)
        tm = min(_round_up(B, 8), _TM_CAP, tm_cap)
        tm = max(8, (tm // 8) * 8)
        # On 2-TensorCore parts (v7x) make sure both cores get a batch slice.
        if small_vmem_part and B >= 256 and pl.cdiv(B, tm) < 2:
            tm = min(tm, max(8, _round_up(pl.cdiv(B, 2), 8)))
    grid_m = pl.cdiv(B, tm)

    # ---- MXU vs VPU per operand (lane-sparse MXU loses at tiny K / tiny tm).
    use_vpu0 = (D0 <= _VPU_K_MAX) or (D0 <= _VPU_K_SMALL_TILE and tm <= _VPU_TM_SMALL)
    use_vpu1 = (D1 <= _VPU_K_MAX) or (D1 <= _VPU_K_SMALL_TILE and tm <= _VPU_TM_SMALL)

    kernel = functools.partial(_random_layer_kernel, scale=scale,
                               use_vpu0=use_vpu0, use_vpu1=use_vpu1)

    # Scoped VMEM we request: actual working set (incl. intermediates) with
    # headroom, clipped to a generation-safe cap.
    working_set = (2 * bpe_x * tm * (D0 + D1)
                   + 2 * bpe_w * (D0 + D1) * tn
                   + 2 * bpe_out * tm * tn
                   + 2 * 4 * tm * tn)
    vmem_limit = int(min(max(working_set * 3 // 2 + (2 << 20), 32 << 20),
                         vmem_limit_cap))

    # W blocks are re-fetched once per batch step when the lane grid has >1 step.
    w_reads = grid_m if grid_n > 1 else 1
    cost = pl.CostEstimate(
        flops=2 * B * O * (D0 + D1) + 2 * B * O,
        transcendentals=0,
        bytes_accessed=int(
            x0.size * bpe_x + x1.size * bpe_x
            + w_reads * (w0.size * bpe_w + w1.size * bpe_w)
            + B * O * bpe_out),
    )

    out = pl.pallas_call(
        kernel,
        out_shape=jax.ShapeDtypeStruct((B, O), out_dtype),
        grid_spec=pltpu.PrefetchScalarGridSpec(
            num_scalar_prefetch=0,
            grid=(grid_m, grid_n),
            in_specs=[
                pl.BlockSpec((tm, D0), lambda i, j: (i, 0)),   # x0 tile
                pl.BlockSpec((tm, D1), lambda i, j: (i, 0)),   # x1 tile
                pl.BlockSpec((D0, tn), lambda i, j: (0, j)),   # W0 (resident if grid_n==1)
                pl.BlockSpec((D1, tn), lambda i, j: (0, j)),   # W1 (resident if grid_n==1)
            ],
            out_specs=pl.BlockSpec((tm, tn), lambda i, j: (i, j)),
        ),
        compiler_params=pltpu.CompilerParams(
            dimension_semantics=("parallel", "parallel"),
            vmem_limit_bytes=vmem_limit,
        ),
        cost_estimate=cost,
    )(x0, x1, w0, w1)

    return out


if __name__ == "__main__":
    # Small shapes consistent with the module's forward:
    #   input_dim_list=[32, 4], output_dim=256, batch=8
    B = 8
    D0, D1 = 32, 4
    OUTPUT_DIM = 256

    key = jax.random.PRNGKey(0)
    k0, k1, kw0, kw1 = jax.random.split(key, 4)

    # Deterministic "torch.randn"-style parameter init (fixed random matrices).
    w0 = jax.random.normal(kw0, (D0, OUTPUT_DIM), dtype=jnp.float32)
    w1 = jax.random.normal(kw1, (D1, OUTPUT_DIM), dtype=jnp.float32)

    # Example inputs (e.g. features and class probabilities in CDAN).
    x0 = jax.random.normal(k0, (B, D0), dtype=jnp.float32)
    x1 = jax.nn.softmax(jax.random.normal(k1, (B, D1), dtype=jnp.float32), axis=-1)

    out = random_layer_pallas(x0, x1, w0, w1, OUTPUT_DIM)
    out = jax.block_until_ready(out)

    # Reference check against plain JAX (same math as the PyTorch forward).
    ref = (x0 @ w0) / math.pow(float(OUTPUT_DIM), 1.0 / 2.0) * (x1 @ w1)
    assert out.shape == (B, OUTPUT_DIM)
    assert jnp.allclose(out, ref, atol=1e-4, rtol=1e-4)

    print("KERNEL_OK")
</pallas_src>

<mosaic_0001>
module attributes {stable_mosaic.version = 11 : i64} {
  func.func @_random_layer_kernel(%arg0: i32, %arg1: i32, %arg2: memref<8x32xf32, #tpu.memory_space<vmem>>, %arg3: memref<8x4xf32, #tpu.memory_space<vmem>>, %arg4: memref<32x256xf32, #tpu.memory_space<vmem>>, %arg5: memref<4x256xf32, #tpu.memory_space<vmem>>, %arg6: memref<8x256xf32, #tpu.memory_space<vmem>>) attributes {dimension_semantics = [#tpu.dimension_semantics<parallel>, #tpu.dimension_semantics<parallel>], iteration_bounds = array<i64: 1, 1>, scalar_prefetch = 0 : i64, scratch_operands = 0 : i64, tpu.core_type = #tpu.core_type<tc>, window_params = [{transform_indices = @transform_0, window_bounds = array<i64: 8, 32>}, {transform_indices = @transform_1, window_bounds = array<i64: 8, 4>}, {transform_indices = @transform_2, window_bounds = array<i64: 32, 256>}, {transform_indices = @transform_3, window_bounds = array<i64: 4, 256>}, {transform_indices = @transform_4, window_bounds = array<i64: 8, 256>}]} {
    %c0 = arith.constant 0 : index
    %c0_0 = arith.constant 0 : index
    %0 = vector.load %arg4[%c0, %c0_0] : memref<32x256xf32, #tpu.memory_space<vmem>>, vector<32x256xf32>
    %cst = arith.constant 6.250000e-02 : f32
    %1 = vector.broadcast %cst : f32 to vector<32x256xf32>
    %2 = arith.mulf %0, %1 : vector<32x256xf32>
    %c0_1 = arith.constant 0 : index
    %c0_2 = arith.constant 0 : index
    %3 = vector.load %arg2[%c0_1, %c0_2] : memref<8x32xf32, #tpu.memory_space<vmem>>, vector<8x32xf32>
    %4 = vector.extract_strided_slice %3 {offsets = [0, 0], sizes = [8, 1], strides = [1, 1]} : vector<8x32xf32> to vector<8x1xf32>
    %5 = vector.extract_strided_slice %2 {offsets = [0, 0], sizes = [1, 256], strides = [1, 1]} : vector<32x256xf32> to vector<1x256xf32>
    %6 = vector.broadcast %4 : vector<8x1xf32> to vector<8x256xf32>
    %7 = vector.broadcast %5 : vector<1x256xf32> to vector<8x256xf32>
    %8 = arith.mulf %6, %7 : vector<8x256xf32>
    %9 = vector.extract_strided_slice %3 {offsets = [0, 1], sizes = [8, 1], strides = [1, 1]} : vector<8x32xf32> to vector<8x1xf32>
    %10 = vector.extract_strided_slice %2 {offsets = [1, 0], sizes = [1, 256], strides = [1, 1]} : vector<32x256xf32> to vector<1x256xf32>
    %11 = vector.broadcast %9 : vector<8x1xf32> to vector<8x256xf32>
    %12 = vector.broadcast %10 : vector<1x256xf32> to vector<8x256xf32>
    %13 = arith.mulf %11, %12 : vector<8x256xf32>
    %14 = arith.addf %8, %13 : vector<8x256xf32>
    %15 = vector.extract_strided_slice %3 {offsets = [0, 2], sizes = [8, 1], strides = [1, 1]} : vector<8x32xf32> to vector<8x1xf32>
    %16 = vector.extract_strided_slice %2 {offsets = [2, 0], sizes = [1, 256], strides = [1, 1]} : vector<32x256xf32> to vector<1x256xf32>
    %17 = vector.broadcast %15 : vector<8x1xf32> to vector<8x256xf32>
    %18 = vector.broadcast %16 : vector<1x256xf32> to vector<8x256xf32>
    %19 = arith.mulf %17, %18 : vector<8x256xf32>
    %20 = arith.addf %14, %19 : vector<8x256xf32>
    %21 = vector.extract_strided_slice %3 {offsets = [0, 3], sizes = [8, 1], strides = [1, 1]} : vector<8x32xf32> to vector<8x1xf32>
    %22 = vector.extract_strided_slice %2 {offsets = [3, 0], sizes = [1, 256], strides = [1, 1]} : vector<32x256xf32> to vector<1x256xf32>
    %23 = vector.broadcast %21 : vector<8x1xf32> to vector<8x256xf32>
    %24 = vector.broadcast %22 : vector<1x256xf32> to vector<8x256xf32>
    %25 = arith.mulf %23, %24 : vector<8x256xf32>
    %26 = arith.addf %20, %25 : vector<8x256xf32>
    %27 = vector.extract_strided_slice %3 {offsets = [0, 4], sizes = [8, 1], strides = [1, 1]} : vector<8x32xf32> to vector<8x1xf32>
    %28 = vector.extract_strided_slice %2 {offsets = [4, 0], sizes = [1, 256], strides = [1, 1]} : vector<32x256xf32> to vector<1x256xf32>
    %29 = vector.broadcast %27 : vector<8x1xf32> to vector<8x256xf32>
    %30 = vector.broadcast %28 : vector<1x256xf32> to vector<8x256xf32>
    %31 = arith.mulf %29, %30 : vector<8x256xf32>
    %32 = arith.addf %26, %31 : vector<8x256xf32>
    %33 = vector.extract_strided_slice %3 {offsets = [0, 5], sizes = [8, 1], strides = [1, 1]} : vector<8x32xf32> to vector<8x1xf32>
    %34 = vector.extract_strided_slice %2 {offsets = [5, 0], sizes = [1, 256], strides = [1, 1]} : vector<32x256xf32> to vector<1x256xf32>
    %35 = vector.broadcast %33 : vector<8x1xf32> to vector<8x256xf32>
    %36 = vector.broadcast %34 : vector<1x256xf32> to vector<8x256xf32>
    %37 = arith.mulf %35, %36 : vector<8x256xf32>
    %38 = arith.addf %32, %37 : vector<8x256xf32>
    %39 = vector.extract_strided_slice %3 {offsets = [0, 6], sizes = [8, 1], strides = [1, 1]} : vector<8x32xf32> to vector<8x1xf32>
    %40 = vector.extract_strided_slice %2 {offsets = [6, 0], sizes = [1, 256], strides = [1, 1]} : vector<32x256xf32> to vector<1x256xf32>
    %41 = vector.broadcast %39 : vector<8x1xf32> to vector<8x256xf32>
    %42 = vector.broadcast %40 : vector<1x256xf32> to vector<8x256xf32>
    %43 = arith.mulf %41, %42 : vector<8x256xf32>
    %44 = arith.addf %38, %43 : vector<8x256xf32>
    %45 = vector.extract_strided_slice %3 {offsets = [0, 7], sizes = [8, 1], strides = [1, 1]} : vector<8x32xf32> to vector<8x1xf32>
    %46 = vector.extract_strided_slice %2 {offsets = [7, 0], sizes = [1, 256], strides = [1, 1]} : vector<32x256xf32> to vector<1x256xf32>
    %47 = vector.broadcast %45 : vector<8x1xf32> to vector<8x256xf32>
    %48 = vector.broadcast %46 : vector<1x256xf32> to vector<8x256xf32>
    %49 = arith.mulf %47, %48 : vector<8x256xf32>
    %50 = arith.addf %44, %49 : vector<8x256xf32>
    %51 = vector.extract_strided_slice %3 {offsets = [0, 8], sizes = [8, 1], strides = [1, 1]} : vector<8x32xf32> to vector<8x1xf32>
    %52 = vector.extract_strided_slice %2 {offsets = [8, 0], sizes = [1, 256], strides = [1, 1]} : vector<32x256xf32> to vector<1x256xf32>
    %53 = vector.broadcast %51 : vector<8x1xf32> to vector<8x256xf32>
    %54 = vector.broadcast %52 : vector<1x256xf32> to vector<8x256xf32>
    %55 = arith.mulf %53, %54 : vector<8x256xf32>
    %56 = arith.addf %50, %55 : vector<8x256xf32>
    %57 = vector.extract_strided_slice %3 {offsets = [0, 9], sizes = [8, 1], strides = [1, 1]} : vector<8x32xf32> to vector<8x1xf32>
    %58 = vector.extract_strided_slice %2 {offsets = [9, 0], sizes = [1, 256], strides = [1, 1]} : vector<32x256xf32> to vector<1x256xf32>
    %59 = vector.broadcast %57 : vector<8x1xf32> to vector<8x256xf32>
    %60 = vector.broadcast %58 : vector<1x256xf32> to vector<8x256xf32>
    %61 = arith.mulf %59, %60 : vector<8x256xf32>
    %62 = arith.addf %56, %61 : vector<8x256xf32>
    %63 = vector.extract_strided_slice %3 {offsets = [0, 10], sizes = [8, 1], strides = [1, 1]} : vector<8x32xf32> to vector<8x1xf32>
    %64 = vector.extract_strided_slice %2 {offsets = [10, 0], sizes = [1, 256], strides = [1, 1]} : vector<32x256xf32> to vector<1x256xf32>
    %65 = vector.broadcast %63 : vector<8x1xf32> to vector<8x256xf32>
    %66 = vector.broadcast %64 : vector<1x256xf32> to vector<8x256xf32>
    %67 = arith.mulf %65, %66 : vector<8x256xf32>
    %68 = arith.addf %62, %67 : vector<8x256xf32>
    %69 = vector.extract_strided_slice %3 {offsets = [0, 11], sizes = [8, 1], strides = [1, 1]} : vector<8x32xf32> to vector<8x1xf32>
    %70 = vector.extract_strided_slice %2 {offsets = [11, 0], sizes = [1, 256], strides = [1, 1]} : vector<32x256xf32> to vector<1x256xf32>
    %71 = vector.broadcast %69 : vector<8x1xf32> to vector<8x256xf32>
    %72 = vector.broadcast %70 : vector<1x256xf32> to vector<8x256xf32>
    %73 = arith.mulf %71, %72 : vector<8x256xf32>
    %74 = arith.addf %68, %73 : vector<8x256xf32>
    %75 = vector.extract_strided_slice %3 {offsets = [0, 12], sizes = [8, 1], strides = [1, 1]} : vector<8x32xf32> to vector<8x1xf32>
    %76 = vector.extract_strided_slice %2 {offsets = [12, 0], sizes = [1, 256], strides = [1, 1]} : vector<32x256xf32> to vector<1x256xf32>
    %77 = vector.broadcast %75 : vector<8x1xf32> to vector<8x256xf32>
    %78 = vector.broadcast %76 : vector<1x256xf32> to vector<8x256xf32>
    %79 = arith.mulf %77, %78 : vector<8x256xf32>
    %80 = arith.addf %74, %79 : vector<8x256xf32>
    %81 = vector.extract_strided_slice %3 {offsets = [0, 13], sizes = [8, 1], strides = [1, 1]} : vector<8x32xf32> to vector<8x1xf32>
    %82 = vector.extract_strided_slice %2 {offsets = [13, 0], sizes = [1, 256], strides = [1, 1]} : vector<32x256xf32> to vector<1x256xf32>
    %83 = vector.broadcast %81 : vector<8x1xf32> to vector<8x256xf32>
    %84 = vector.broadcast %82 : vector<1x256xf32> to vector<8x256xf32>
    %85 = arith.mulf %83, %84 : vector<8x256xf32>
    %86 = arith.addf %80, %85 : vector<8x256xf32>
    %87 = vector.extract_strided_slice %3 {offsets = [0, 14], sizes = [8, 1], strides = [1, 1]} : vector<8x32xf32> to vector<8x1xf32>
    %88 = vector.extract_strided_slice %2 {offsets = [14, 0], sizes = [1, 256], strides = [1, 1]} : vector<32x256xf32> to vector<1x256xf32>
    %89 = vector.broadcast %87 : vector<8x1xf32> to vector<8x256xf32>
    %90 = vector.broadcast %88 : vector<1x256xf32> to vector<8x256xf32>
    %91 = arith.mulf %89, %90 : vector<8x256xf32>
    %92 = arith.addf %86, %91 : vector<8x256xf32>
    %93 = vector.extract_strided_slice %3 {offsets = [0, 15], sizes = [8, 1], strides = [1, 1]} : vector<8x32xf32> to vector<8x1xf32>
    %94 = vector.extract_strided_slice %2 {offsets = [15, 0], sizes = [1, 256], strides = [1, 1]} : vector<32x256xf32> to vector<1x256xf32>
    %95 = vector.broadcast %93 : vector<8x1xf32> to vector<8x256xf32>
    %96 = vector.broadcast %94 : vector<1x256xf32> to vector<8x256xf32>
    %97 = arith.mulf %95, %96 : vector<8x256xf32>
    %98 = arith.addf %92, %97 : vector<8x256xf32>
    %99 = vector.extract_strided_slice %3 {offsets = [0, 16], sizes = [8, 1], strides = [1, 1]} : vector<8x32xf32> to vector<8x1xf32>
    %100 = vector.extract_strided_slice %2 {offsets = [16, 0], sizes = [1, 256], strides = [1, 1]} : vector<32x256xf32> to vector<1x256xf32>
    %101 = vector.broadcast %99 : vector<8x1xf32> to vector<8x256xf32>
    %102 = vector.broadcast %100 : vector<1x256xf32> to vector<8x256xf32>
    %103 = arith.mulf %101, %102 : vector<8x256xf32>
    %104 = arith.addf %98, %103 : vector<8x256xf32>
    %105 = vector.extract_strided_slice %3 {offsets = [0, 17], sizes = [8, 1], strides = [1, 1]} : vector<8x32xf32> to vector<8x1xf32>
    %106 = vector.extract_strided_slice %2 {offsets = [17, 0], sizes = [1, 256], strides = [1, 1]} : vector<32x256xf32> to vector<1x256xf32>
    %107 = vector.broadcast %105 : vector<8x1xf32> to vector<8x256xf32>
    %108 = vector.broadcast %106 : vector<1x256xf32> to vector<8x256xf32>
    %109 = arith.mulf %107, %108 : vector<8x256xf32>
    %110 = arith.addf %104, %109 : vector<8x256xf32>
    %111 = vector.extract_strided_slice %3 {offsets = [0, 18], sizes = [8, 1], strides = [1, 1]} : vector<8x32xf32> to vector<8x1xf32>
    %112 = vector.extract_strided_slice %2 {offsets = [18, 0], sizes = [1, 256], strides = [1, 1]} : vector<32x256xf32> to vector<1x256xf32>
    %113 = vector.broadcast %111 : vector<8x1xf32> to vector<8x256xf32>
    %114 = vector.broadcast %112 : vector<1x256xf32> to vector<8x256xf32>
    %115 = arith.mulf %113, %114 : vector<8x256xf32>
    %116 = arith.addf %110, %115 : vector<8x256xf32>
    %117 = vector.extract_strided_slice %3 {offsets = [0, 19], sizes = [8, 1], strides = [1, 1]} : vector<8x32xf32> to vector<8x1xf32>
    %118 = vector.extract_strided_slice %2 {offsets = [19, 0], sizes = [1, 256], strides = [1, 1]} : vector<32x256xf32> to vector<1x256xf32>
    %119 = vector.broadcast %117 : vector<8x1xf32> to vector<8x256xf32>
    %120 = vector.broadcast %118 : vector<1x256xf32> to vector<8x256xf32>
    %121 = arith.mulf %119, %120 : vector<8x256xf32>
    %122 = arith.addf %116, %121 : vector<8x256xf32>
    %123 = vector.extract_strided_slice %3 {offsets = [0, 20], sizes = [8, 1], strides = [1, 1]} : vector<8x32xf32> to vector<8x1xf32>
    %124 = vector.extract_strided_slice %2 {offsets = [20, 0], sizes = [1, 256], strides = [1, 1]} : vector<32x256xf32> to vector<1x256xf32>
    %125 = vector.broadcast %123 : vector<8x1xf32> to vector<8x256xf32>
    %126 = vector.broadcast %124 : vector<1x256xf32> to vector<8x256xf32>
    %127 = arith.mulf %125, %126 : vector<8x256xf32>
    %128 = arith.addf %122, %127 : vector<8x256xf32>
    %129 = vector.extract_strided_slice %3 {offsets = [0, 21], sizes = [8, 1], strides = [1, 1]} : vector<8x32xf32> to vector<8x1xf32>
    %130 = vector.extract_strided_slice %2 {offsets = [21, 0], sizes = [1, 256], strides = [1, 1]} : vector<32x256xf32> to vector<1x256xf32>
    %131 = vector.broadcast %129 : vector<8x1xf32> to vector<8x256xf32>
    %132 = vector.broadcast %130 : vector<1x256xf32> to vector<8x256xf32>
    %133 = arith.mulf %131, %132 : vector<8x256xf32>
    %134 = arith.addf %128, %133 : vector<8x256xf32>
    %135 = vector.extract_strided_slice %3 {offsets = [0, 22], sizes = [8, 1], strides = [1, 1]} : vector<8x32xf32> to vector<8x1xf32>
    %136 = vector.extract_strided_slice %2 {offsets = [22, 0], sizes = [1, 256], strides = [1, 1]} : vector<32x256xf32> to vector<1x256xf32>
    %137 = vector.broadcast %135 : vector<8x1xf32> to vector<8x256xf32>
    %138 = vector.broadcast %136 : vector<1x256xf32> to vector<8x256xf32>
    %139 = arith.mulf %137, %138 : vector<8x256xf32>
    %140 = arith.addf %134, %139 : vector<8x256xf32>
    %141 = vector.extract_strided_slice %3 {offsets = [0, 23], sizes = [8, 1], strides = [1, 1]} : vector<8x32xf32> to vector<8x1xf32>
    %142 = vector.extract_strided_slice %2 {offsets = [23, 0], sizes = [1, 256], strides = [1, 1]} : vector<32x256xf32> to vector<1x256xf32>
    %143 = vector.broadcast %141 : vector<8x1xf32> to vector<8x256xf32>
    %144 = vector.broadcast %142 : vector<1x256xf32> to vector<8x256xf32>
    %145 = arith.mulf %143, %144 : vector<8x256xf32>
    %146 = arith.addf %140, %145 : vector<8x256xf32>
    %147 = vector.extract_strided_slice %3 {offsets = [0, 24], sizes = [8, 1], strides = [1, 1]} : vector<8x32xf32> to vector<8x1xf32>
    %148 = vector.extract_strided_slice %2 {offsets = [24, 0], sizes = [1, 256], strides = [1, 1]} : vector<32x256xf32> to vector<1x256xf32>
    %149 = vector.broadcast %147 : vector<8x1xf32> to vector<8x256xf32>
    %150 = vector.broadcast %148 : vector<1x256xf32> to vector<8x256xf32>
    %151 = arith.mulf %149, %150 : vector<8x256xf32>
    %152 = arith.addf %146, %151 : vector<8x256xf32>
    %153 = vector.extract_strided_slice %3 {offsets = [0, 25], sizes = [8, 1], strides = [1, 1]} : vector<8x32xf32> to vector<8x1xf32>
    %154 = vector.extract_strided_slice %2 {offsets = [25, 0], sizes = [1, 256], strides = [1, 1]} : vector<32x256xf32> to vector<1x256xf32>
    %155 = vector.broadcast %153 : vector<8x1xf32> to vector<8x256xf32>
    %156 = vector.broadcast %154 : vector<1x256xf32> to vector<8x256xf32>
    %157 = arith.mulf %155, %156 : vector<8x256xf32>
    %158 = arith.addf %152, %157 : vector<8x256xf32>
    %159 = vector.extract_strided_slice %3 {offsets = [0, 26], sizes = [8, 1], strides = [1, 1]} : vector<8x32xf32> to vector<8x1xf32>
    %160 = vector.extract_strided_slice %2 {offsets = [26, 0], sizes = [1, 256], strides = [1, 1]} : vector<32x256xf32> to vector<1x256xf32>
    %161 = vector.broadcast %159 : vector<8x1xf32> to vector<8x256xf32>
    %162 = vector.broadcast %160 : vector<1x256xf32> to vector<8x256xf32>
    %163 = arith.mulf %161, %162 : vector<8x256xf32>
    %164 = arith.addf %158, %163 : vector<8x256xf32>
    %165 = vector.extract_strided_slice %3 {offsets = [0, 27], sizes = [8, 1], strides = [1, 1]} : vector<8x32xf32> to vector<8x1xf32>
    %166 = vector.extract_strided_slice %2 {offsets = [27, 0], sizes = [1, 256], strides = [1, 1]} : vector<32x256xf32> to vector<1x256xf32>
    %167 = vector.broadcast %165 : vector<8x1xf32> to vector<8x256xf32>
    %168 = vector.broadcast %166 : vector<1x256xf32> to vector<8x256xf32>
    %169 = arith.mulf %167, %168 : vector<8x256xf32>
    %170 = arith.addf %164, %169 : vector<8x256xf32>
    %171 = vector.extract_strided_slice %3 {offsets = [0, 28], sizes = [8, 1], strides = [1, 1]} : vector<8x32xf32> to vector<8x1xf32>
    %172 = vector.extract_strided_slice %2 {offsets = [28, 0], sizes = [1, 256], strides = [1, 1]} : vector<32x256xf32> to vector<1x256xf32>
    %173 = vector.broadcast %171 : vector<8x1xf32> to vector<8x256xf32>
    %174 = vector.broadcast %172 : vector<1x256xf32> to vector<8x256xf32>
    %175 = arith.mulf %173, %174 : vector<8x256xf32>
    %176 = arith.addf %170, %175 : vector<8x256xf32>
    %177 = vector.extract_strided_slice %3 {offsets = [0, 29], sizes = [8, 1], strides = [1, 1]} : vector<8x32xf32> to vector<8x1xf32>
    %178 = vector.extract_strided_slice %2 {offsets = [29, 0], sizes = [1, 256], strides = [1, 1]} : vector<32x256xf32> to vector<1x256xf32>
    %179 = vector.broadcast %177 : vector<8x1xf32> to vector<8x256xf32>
    %180 = vector.broadcast %178 : vector<1x256xf32> to vector<8x256xf32>
    %181 = arith.mulf %179, %180 : vector<8x256xf32>
    %182 = arith.addf %176, %181 : vector<8x256xf32>
    %183 = vector.extract_strided_slice %3 {offsets = [0, 30], sizes = [8, 1], strides = [1, 1]} : vector<8x32xf32> to vector<8x1xf32>
    %184 = vector.extract_strided_slice %2 {offsets = [30, 0], sizes = [1, 256], strides = [1, 1]} : vector<32x256xf32> to vector<1x256xf32>
    %185 = vector.broadcast %183 : vector<8x1xf32> to vector<8x256xf32>
    %186 = vector.broadcast %184 : vector<1x256xf32> to vector<8x256xf32>
    %187 = arith.mulf %185, %186 : vector<8x256xf32>
    %188 = arith.addf %182, %187 : vector<8x256xf32>
    %189 = vector.extract_strided_slice %3 {offsets = [0, 31], sizes = [8, 1], strides = [1, 1]} : vector<8x32xf32> to vector<8x1xf32>
    %190 = vector.extract_strided_slice %2 {offsets = [31, 0], sizes = [1, 256], strides = [1, 1]} : vector<32x256xf32> to vector<1x256xf32>
    %191 = vector.broadcast %189 : vector<8x1xf32> to vector<8x256xf32>
    %192 = vector.broadcast %190 : vector<1x256xf32> to vector<8x256xf32>
    %193 = arith.mulf %191, %192 : vector<8x256xf32>
    %194 = arith.addf %188, %193 : vector<8x256xf32>
    %c0_3 = arith.constant 0 : index
    %c0_4 = arith.constant 0 : index
    %195 = vector.load %arg3[%c0_3, %c0_4] : memref<8x4xf32, #tpu.memory_space<vmem>>, vector<8x4xf32>
    %c0_5 = arith.constant 0 : index
    %c0_6 = arith.constant 0 : index
    %196 = vector.load %arg5[%c0_5, %c0_6] : memref<4x256xf32, #tpu.memory_space<vmem>>, vector<4x256xf32>
    %197 = vector.extract_strided_slice %195 {offsets = [0, 0], sizes = [8, 1], strides = [1, 1]} : vector<8x4xf32> to vector<8x1xf32>
    %198 = vector.extract_strided_slice %196 {offsets = [0, 0], sizes = [1, 256], strides = [1, 1]} : vector<4x256xf32> to vector<1x256xf32>
    %199 = vector.broadcast %197 : vector<8x1xf32> to vector<8x256xf32>
    %200 = vector.broadcast %198 : vector<1x256xf32> to vector<8x256xf32>
    %201 = arith.mulf %199, %200 : vector<8x256xf32>
    %202 = vector.extract_strided_slice %195 {offsets = [0, 1], sizes = [8, 1], strides = [1, 1]} : vector<8x4xf32> to vector<8x1xf32>
    %203 = vector.extract_strided_slice %196 {offsets = [1, 0], sizes = [1, 256], strides = [1, 1]} : vector<4x256xf32> to vector<1x256xf32>
    %204 = vector.broadcast %202 : vector<8x1xf32> to vector<8x256xf32>
    %205 = vector.broadcast %203 : vector<1x256xf32> to vector<8x256xf32>
    %206 = arith.mulf %204, %205 : vector<8x256xf32>
    %207 = arith.addf %201, %206 : vector<8x256xf32>
    %208 = vector.extract_strided_slice %195 {offsets = [0, 2], sizes = [8, 1], strides = [1, 1]} : vector<8x4xf32> to vector<8x1xf32>
    %209 = vector.extract_strided_slice %196 {offsets = [2, 0], sizes = [1, 256], strides = [1, 1]} : vector<4x256xf32> to vector<1x256xf32>
    %210 = vector.broadcast %208 : vector<8x1xf32> to vector<8x256xf32>
    %211 = vector.broadcast %209 : vector<1x256xf32> to vector<8x256xf32>
    %212 = arith.mulf %210, %211 : vector<8x256xf32>
    %213 = arith.addf %207, %212 : vector<8x256xf32>
    %214 = vector.extract_strided_slice %195 {offsets = [0, 3], sizes = [8, 1], strides = [1, 1]} : vector<8x4xf32> to vector<8x1xf32>
    %215 = vector.extract_strided_slice %196 {offsets = [3, 0], sizes = [1, 256], strides = [1, 1]} : vector<4x256xf32> to vector<1x256xf32>
    %216 = vector.broadcast %214 : vector<8x1xf32> to vector<8x256xf32>
    %217 = vector.broadcast %215 : vector<1x256xf32> to vector<8x256xf32>
    %218 = arith.mulf %216, %217 : vector<8x256xf32>
    %219 = arith.addf %213, %218 : vector<8x256xf32>
    %220 = arith.mulf %194, %219 : vector<8x256xf32>
    %c0_7 = arith.constant 0 : index
    %c0_8 = arith.constant 0 : index
    %221 = vector.load %arg6[%c0_7, %c0_8] : memref<8x256xf32, #tpu.memory_space<vmem>>, vector<8x256xf32>
    tpu.vector_store %arg6[%c0_7, %c0_8], %220 {strides = array<i32>} : memref<8x256xf32, #tpu.memory_space<vmem>>, vector<8x256xf32>,
    return
  }
  func.func @transform_0(%arg0: i32, %arg1: i32) -> (i32, i32) {
    %c0_i32 = arith.constant 0 : i32
    %c0_i32_0 = arith.constant 0 : i32
    return %arg0, %c0_i32 : i32, i32
  }
  func.func @transform_1(%arg0: i32, %arg1: i32) -> (i32, i32) {
    %c0_i32 = arith.constant 0 : i32
    %c0_i32_0 = arith.constant 0 : i32
    return %arg0, %c0_i32 : i32, i32
  }
  func.func @transform_2(%arg0: i32, %arg1: i32) -> (i32, i32) {
    %c0_i32 = arith.constant 0 : i32
    %c0_i32_0 = arith.constant 0 : i32
    return %c0_i32, %arg1 : i32, i32
  }
  func.func @transform_3(%arg0: i32, %arg1: i32) -> (i32, i32) {
    %c0_i32 = arith.constant 0 : i32
    %c0_i32_0 = arith.constant 0 : i32
    return %c0_i32, %arg1 : i32, i32
  }
  func.func @transform_4(%arg0: i32, %arg1: i32) -> (i32, i32) {
    %c0_i32 = arith.constant 0 : i32
    return %arg0, %arg1 : i32, i32
  }
}

</mosaic_0001>

<bundles_post_ra>
// kernel: tpu_custom_call.1
= control target key start
LH: loop header
LB: loop body
LE: loop exit
PB: predicated region body
PF: predicated region fallthrough
CT: control target
= control target key end

     0   :  { %9 = vsyncpa [#allocation3], 0  ;;  %s820_s0 = inlined_call_operand.vmem [shape: f32[8,32], index: 0, kind: input, shape index: {}]   ;;  %s821_s1 = inlined_call_operand.vmem [shape: f32[8,4], index: 1, kind: input, shape index: {}]   ;;  %s822_s2 = inlined_call_operand.hbm [shape: f32[32,256], index: 2, kind: input, shape index: {}]   ;;  %s823_s3 = inlined_call_operand.hbm [shape: f32[4,256], index: 3, kind: input, shape index: {}]   ;;  %s824_s4 = inlined_call_operand.hbm [shape: f32[8,256], index: 4, kind: output, shape index: {}]  }
   0x1   :  { %10 = vsyncpa [#allocation6], 0 }
   0x2   :  { %11 = vsyncpa [#allocation4], 0  ;;  %s20_s17 = sshll.u32 %s822_s2, 4  ;;  %s616_s18 = smov [#allocation2]   ;;  %s21_s17 = int_to_ptr.hbm [resolvable:$true] %s20_s17 }
   0x3   :  { %s22_s19 = sshll.u32 %s616_s18, 4  ;;  %s34_s22 = sshll.u32 %s823_s3, 4  ;;  %s23_s19 = int_to_ptr.vmem [resolvable:$true] %s22_s19  ;;  %s35_s22 = int_to_ptr.hbm [resolvable:$true] %s34_s22 }
   0x4   :  { %s617_s23 = smov 256   ;;  %s618_s24 = smov 16  }
   0x5   :  { %28 = dma.hbm_to_vmem [thread:$0]  %s21_s17, 1024, %s23_s19, [#allocation3], %s617_s23, %s617_s23, %s618_s24  }
   0x6   :  { %s619_s25 = smov [#allocation5]  }
   0x7   :  { %s36_s26 = sshll.u32 %s619_s25, 4  ;;  %s37_s26 = int_to_ptr.vmem [resolvable:$true] %s36_s26 }
   0x8   :  { %39 = dma.hbm_to_vmem [thread:$0]  %s35_s22, 128, %s37_s26, [#allocation6]  }
   0x9   :  { %610 = dma.done.wait [#allocation3], 1024  }
   0xa   :  { %611 = vsyncadd [#allocation3], 4294966272 }
   0xb   :  { %612 = dma.done.wait [#allocation6], 128  }
   0xc   :  { %613 = vsyncadd [#allocation6], 4294967168  ;;  %v620_v0 = vmov 2   ;;  %v621_v1 = vmov 0   ;;  %v622_v2 = vmov 4   ;;  %v689_v3 = vld [vmem:[%s820_s0] sm:$0xff] }
   0xd   :  { %503 = vset.pattern.permute.xlu1 %v620_v0  ;;  %501 = vset.pattern.permute.xlu0 %v621_v1  ;;  %v623_v4 = vmov 3   ;;  %v624_v5 = vmov 1   ;;  %v625_v6 = vmov 5   ;;  %v626_v7 = vmov 6   ;;  %v384_v26 = vld [vmem:[%s821_s1] sm:$0xff]  ;;  %v49_v40 = vld [vmem:[#allocation2 + $0x8] sm:$0xff] }
   0xe   :  { %505 = vset.pattern.permute.xlu2 %v622_v2  ;;  %85 = vperm.xlu1 %503, %v689_v3   ;;  %v627_v8 = vmov 8   ;;  %v628_v9 = vmov 7   ;;  %v629_v10 = vmov 9   ;;  %v630_v11 = vmov 13   ;;  %v48_v39 = vld [vmem:[#allocation2] sm:$0xff]  ;;  %s652_s1 = smov [#allocation7]  }
   0xf   :  { %67 = vperm.xlu0 %501, %v689_v3   ;;  %105 = vperm.xlu2 %505, %v689_v3   ;;  %v631_v12 = vmov 10   ;;  %v632_v13 = vmov 11   ;;  %v633_v14 = vmov 18   ;;  %v634_v15 = vmov 12   ;;  %s451_s28 = sshll.u32 %s652_s1, 4  ;;  %s453_s5 = sshll.u32 %s824_s4, 4  ;;  %s452_s28 = int_to_ptr.vmem [resolvable:$true] %s451_s28  ;;  %s454_s5 = int_to_ptr.hbm [resolvable:$true] %s453_s5 }
  0x10   :  { %v635_v16 = vmov 14   ;;  %v636_v17 = vmov 23   ;;  %v637_v18 = vmov 15   ;;  %v638_v19 = vmov 16  }
  0x11   :  { %v639_v20 = vmov 17   ;;  %v640_v21 = vmov 28   ;;  %v641_v22 = vmov 19   ;;  %v642_v23 = vmov 20  }
  0x12   :  { %v643_v24 = vmov 21   ;;  %v644_v25 = vmov 22   ;;  %v645_v27 = vmov 24   ;;  %v646_v28 = vmov 25  }
  0x13   :  { %v647_v29 = vmov 26   ;;  %v648_v30 = vmov 27   ;;  %v649_v31 = vmov 29   ;;  %v650_v34 = vmov 30  }
  0x14   :  { %v651_v36 = vmov 31   ;;  %v56_v42 = vmul.f32 0.0625, %v48_v39  ;;  %v57_v43 = vmul.f32 0.0625, %v49_v40 }
  0x16   :  { %504 = vset.pattern.permute.xlu1 %v623_v4  ;;  %v70_v44 = vperm.slane %v56_v42, 0  ;;  %v71_v45 = vperm.slane %v57_v43, 0  ;;  %v78_v46 = vperm.slane %v56_v42, 1  ;;  %v79_v47 = vperm.slane %v57_v43, 1 }
  0x17   :  { %502 = vset.pattern.permute.xlu0 %v624_v5  ;;  %95 = vperm.xlu1 %504, %v689_v3   ;;  %v88_v54 = vperm.slane %v56_v42, 2  ;;  %v89_v55 = vperm.slane %v57_v43, 2  ;;  %v98_v61 = vperm.slane %v56_v42, 3  ;;  %v99_v62 = vperm.slane %v57_v43, 3 }
  0x18   :  { %75 = vperm.xlu0 %502, %v689_v3   ;;  %506 = vset.pattern.permute.xlu2 %v625_v6  ;;  %v108_v2 = vperm.slane %v56_v42, 4 }
  0x19   :  { %115 = vperm.xlu2 %506, %v689_v3  }
  0x1f   :  { %507 = vset.pattern.permute.xlu1 %v626_v7 }
  0x20   :  { %509 = vset.pattern.permute.xlu0 %v627_v8  ;;  %125 = vperm.xlu1 %507, %v689_v3  }
  0x21   :  { %145 = vperm.xlu0 %509, %v689_v3   ;;  %508 = vset.pattern.permute.xlu2 %v628_v9 }
  0x22   :  { %135 = vperm.xlu2 %508, %v689_v3  }
  0x28   :  { %510 = vset.pattern.permute.xlu1 %v629_v10 }
  0x29   :  { %514 = vset.pattern.permute.xlu0 %v630_v11  ;;  %155 = vperm.xlu1 %510, %v689_v3   ;;  %v118_v11 = vperm.slane %v56_v42, 5 }
  0x2a   :  { %195 = vperm.xlu0 %514, %v689_v3   ;;  %511 = vset.pattern.permute.xlu2 %v631_v12  ;;  %v119_v12 = vperm.slane %v57_v43, 5 }
  0x2b   :  { %165 = vperm.xlu2 %511, %v689_v3  }
  0x31   :  { %512 = vset.pattern.permute.xlu1 %v632_v13 }
  0x32   :  { %519 = vset.pattern.permute.xlu0 %v633_v14  ;;  %175 = vperm.xlu1 %512, %v689_v3  }
  0x33   :  { %245 = vperm.xlu0 %519, %v689_v3   ;;  %513 = vset.pattern.permute.xlu2 %v634_v15  ;;  %v128_v15 = vperm.slane %v56_v42, 6 }
  0x34   :  { %185 = vperm.xlu2 %513, %v689_v3  }
  0x3a   :  { %515 = vset.pattern.permute.xlu1 %v635_v16  ;;  %v129_v16 = vperm.slane %v57_v43, 6 }
  0x3b   :  { %524 = vset.pattern.permute.xlu0 %v636_v17  ;;  %205 = vperm.xlu1 %515, %v689_v3   ;;  %v50_v17 = vld [vmem:[#allocation2 + $0x10] sm:$0xff] }
  0x3c   :  { %295 = vperm.xlu0 %524, %v689_v3   ;;  %516 = vset.pattern.permute.xlu2 %v637_v18  ;;  %v51_v18 = vld [vmem:[#allocation2 + $0x18] sm:$0xff] }
  0x3d   :  { %215 = vperm.xlu2 %516, %v689_v3  }
  0x43   :  { %517 = vset.pattern.permute.xlu1 %v638_v19 }
  0x44   :  { %225 = vperm.xlu1 %517, %v689_v3   ;;  %529 = vset.pattern.permute.xlu0 %v640_v21  ;;  %v739_v21 = vmul.f32 0.0625, %v50_v17 }
  0x45   :  { %518 = vset.pattern.permute.xlu2 %v639_v20  ;;  %345 = vperm.xlu0 %529, %v689_v3  }
  0x46   :  { %235 = vperm.xlu2 %518, %v689_v3   ;;  %v158_v39 = vperm.slane %v739_v21, 1 }
  0x4c   :  { %520 = vset.pattern.permute.xlu1 %v641_v22  ;;  %v741_v22 = vmul.f32 0.0625, %v51_v18 }
  0x4d   :  { %255 = vperm.xlu1 %520, %v689_v3   ;;  %534 = vset.pattern.permute.xlu0 %v620_v0 }
  0x4e   :  { %521 = vset.pattern.permute.xlu2 %v642_v23  ;;  %415 = vperm.xlu0 %534, %v384_v26   ;;  %v159_v40 = vperm.slane %v741_v22, 1 }
  0x4f   :  { %265 = vperm.xlu2 %521, %v689_v3  }
  0x55   :  { %522 = vset.pattern.permute.xlu1 %v643_v24 }
  0x56   :  { %275 = vperm.xlu1 %522, %v689_v3   ;;  %537 = vset.pattern.permute.xlu0 %v623_v4 }
  0x57   :  { %523 = vset.pattern.permute.xlu2 %v644_v25 }
  0x58   :  { %285 = vperm.xlu2 %523, %v689_v3  }
  0x5e   :  { %525 = vset.pattern.permute.xlu1 %v645_v27 }
  0x5f   :  { %305 = vperm.xlu1 %525, %v689_v3  }
  0x60   :  { %526 = vset.pattern.permute.xlu2 %v646_v28 }
  0x61   :  { %315 = vperm.xlu2 %526, %v689_v3  }
  0x67   :  { %527 = vset.pattern.permute.xlu1 %v647_v29  ;;  %v138_v29 = vperm.slane %v56_v42, 7 }
  0x68   :  { %325 = vperm.xlu1 %527, %v689_v3  }
  0x69   :  { %528 = vset.pattern.permute.xlu2 %v648_v30  ;;  %v106_v32 = vpop.permute.xlu2 %105  ;;  %v139_v30 = vperm.slane %v57_v43, 7 }
  0x6a   :  { %335 = vperm.xlu2 %528, %v689_v3   ;;  %v110_v9 = vmul.f32 %v108_v2, %v106_v32 }
  0x70   :  { %530 = vset.pattern.permute.xlu1 %v649_v31 }
  0x71   :  { %355 = vperm.xlu1 %530, %v689_v3  }
  0x72   :  { %531 = vset.pattern.permute.xlu2 %v621_v1 }
  0x73   :  { %388 = vperm.xlu2 %531, %v384_v26   ;;  %v116_v33 = vpop.permute.xlu2 %115 }
  0x74   :  { %v120_v19 = vmul.f32 %v118_v11, %v116_v33  ;;  %v121_v20 = vmul.f32 %v119_v12, %v116_v33  ;;  %v208_v12 = vperm.slane %v739_v21, 6 }
  0x79   :  { %532 = vset.pattern.permute.xlu1 %v624_v5 }
  0x7a   :  { %401 = vperm.xlu1 %532, %v384_v26  }
  0x7b   :  { %533 = vset.pattern.permute.xlu2 %v650_v34  ;;  %v148_v34 = vperm.slane %v739_v21, 0 }
  0x7c   :  { %365 = vperm.xlu2 %533, %v689_v3   ;;  %v733_v38 = vpop.permute.xlu2 %135 }
  0x80   :  { %v86_v35 = vpop.permute.xlu1 %85 }
  0x81   :  { %v68_v37 = vpop.permute.xlu0 %67  ;;  %v90_v59 = vmul.f32 %v88_v54, %v86_v35  ;;  %v91_v60 = vmul.f32 %v89_v55, %v86_v35  ;;  %v149_v35 = vperm.slane %v741_v22, 0  ;;  %v179_v54 = vperm.slane %v741_v22, 3 }
  0x82   :  { %535 = vset.pattern.permute.xlu1 %v651_v36  ;;  %v72_v50 = vmul.f32 %v70_v44, %v68_v37  ;;  %v73_v51 = vmul.f32 %v71_v45, %v68_v37  ;;  %v140_v36 = vmul.f32 %v138_v29, %v733_v38  ;;  %v141_v37 = vmul.f32 %v139_v30, %v733_v38 }
  0x83   :  { %375 = vperm.xlu1 %535, %v689_v3   ;;  %v109_v3 = vperm.slane %v57_v43, 4  ;;  %v178_v38 = vperm.slane %v739_v21, 3 }
  0x84   :  { %536 = vset.pattern.permute.xlu2 %v623_v4 }
  0x85   :  { %429 = vperm.xlu2 %536, %v384_v26   ;;  %v735_v49 = vpop.permute.xlu2 %165  ;;  %v111_v10 = vmul.f32 %v109_v3, %v106_v32 }
  0x89   :  { %v96_v41 = vpop.permute.xlu1 %95 }
  0x8a   :  { %v76_v48 = vpop.permute.xlu0 %75  ;;  %v100_v4 = vmul.f32 %v98_v61, %v96_v41  ;;  %v101_v5 = vmul.f32 %v99_v62, %v96_v41  ;;  %v188_v61 = vperm.slane %v739_v21, 4  ;;  %v189_v62 = vperm.slane %v741_v22, 4 }
  0x8b   :  { %v80_v52 = vmul.f32 %v78_v46, %v76_v48  ;;  %v81_v53 = vmul.f32 %v79_v47, %v76_v48 }
  0x8d   :  { %v82_v57 = vadd.f32 %v80_v52, %v72_v50  ;;  %v83_v58 = vadd.f32 %v81_v53, %v73_v51  ;;  %v168_v50 = vperm.slane %v739_v21, 2  ;;  %v169_v51 = vperm.slane %v741_v22, 2 }
  0x8e   :  { %v737_v1 = vpop.permute.xlu2 %185 }
  0x8f   :  { %v92_v63 = vadd.f32 %v90_v59, %v82_v57  ;;  %v93_v0 = vadd.f32 %v91_v60, %v83_v58  ;;  %v170_v57 = vmul.f32 %v168_v50, %v735_v49  ;;  %v171_v58 = vmul.f32 %v169_v51, %v735_v49 }
  0x90   :  { %v191_v11 = vmul.f32 %v189_v62, %v737_v1 }
  0x91   :  { %v102_v7 = vadd.f32 %v100_v4, %v92_v63  ;;  %v103_v8 = vadd.f32 %v101_v5, %v93_v0 }
  0x92   :  { %v126_v56 = vpop.permute.xlu1 %125 }
  0x93   :  { %v112_v13 = vadd.f32 %v110_v9, %v102_v7  ;;  %v113_v14 = vadd.f32 %v111_v10, %v103_v8  ;;  %v130_v26 = vmul.f32 %v128_v15, %v126_v56  ;;  %v131_v27 = vmul.f32 %v129_v16, %v126_v56  ;;  %v146_v33 = vpop.permute.xlu0 %145  ;;  %v52_v8 = vld [vmem:[#allocation2 + $0x20] sm:$0xff]  ;;  %v53_v9 = vld [vmem:[#allocation2 + $0x28] sm:$0xff] }
  0x94   :  { %v150_v45 = vmul.f32 %v148_v34, %v146_v33  ;;  %v151_v42 = vmul.f32 %v149_v35, %v146_v33  ;;  %v199_v7 = vperm.slane %v741_v22, 5  ;;  %v190_v10 = vmul.f32 %v188_v61, %v737_v1 }
  0x95   :  { %v122_v24 = vadd.f32 %v120_v19, %v112_v13  ;;  %v123_v25 = vadd.f32 %v121_v20, %v113_v14  ;;  %v209_v13 = vperm.slane %v741_v22, 6  ;;  %v769_v14 = vmul.f32 0.0625, %v52_v8 }
  0x96   :  { %v771_v15 = vmul.f32 0.0625, %v53_v9 }
  0x97   :  { %v743_v23 = vpop.permute.xlu2 %215  ;;  %v132_v31 = vadd.f32 %v130_v26, %v122_v24  ;;  %v133_v32 = vadd.f32 %v131_v27, %v123_v25  ;;  %v218_v25 = vperm.slane %v739_v21, 7  ;;  %v219_v26 = vperm.slane %v741_v22, 7 }
  0x98   :  { %v228_v29 = vperm.slane %v769_v14, 0  ;;  %v229_v30 = vperm.slane %v771_v15, 0  ;;  %v239_v22 = vperm.slane %v771_v15, 1  ;;  %v258_v50 = vperm.slane %v769_v14, 3 }
  0x99   :  { %v142_v41 = vadd.f32 %v140_v36, %v132_v31  ;;  %v143_v44 = vadd.f32 %v141_v37, %v133_v32  ;;  %v220_v35 = vmul.f32 %v218_v25, %v743_v23  ;;  %v221_v33 = vmul.f32 %v219_v26, %v743_v23 }
  0x9a   :  { %v259_v51 = vperm.slane %v771_v15, 3  ;;  %v278_v62 = vperm.slane %v769_v14, 5 }
  0x9b   :  { %v156_v6 = vpop.permute.xlu1 %155  ;;  %v152_v52 = vadd.f32 %v150_v45, %v142_v41  ;;  %v153_v53 = vadd.f32 %v151_v42, %v143_v44  ;;  %v248_v45 = vperm.slane %v769_v14, 2  ;;  %v249_v42 = vperm.slane %v771_v15, 2 }
  0x9c   :  { %v160_v47 = vmul.f32 %v158_v39, %v156_v6  ;;  %v161_v48 = vmul.f32 %v159_v40, %v156_v6  ;;  %v198_v6 = vperm.slane %v739_v21, 5  ;;  %v196_v49 = vpop.permute.xlu0 %195  ;;  %v238_v21 = vperm.slane %v769_v14, 1 }
  0x9d   :  { %v201_v19 = vmul.f32 %v199_v7, %v196_v49 }
  0x9e   :  { %v162_v55 = vadd.f32 %v160_v47, %v152_v52  ;;  %v163_v56 = vadd.f32 %v161_v48, %v153_v53  ;;  %v200_v18 = vmul.f32 %v198_v6, %v196_v49  ;;  %v288_v49 = vperm.slane %v769_v14, 6 }
  0xa0   :  { %v751_v46 = vpop.permute.xlu2 %235  ;;  %v172_v63 = vadd.f32 %v170_v57, %v162_v55  ;;  %v173_v0 = vadd.f32 %v171_v58, %v163_v56  ;;  %v268_v58 = vperm.slane %v769_v14, 4 }
  0xa1   :  { %v240_v48 = vmul.f32 %v238_v21, %v751_v46  ;;  %v241_v23 = vmul.f32 %v239_v22, %v751_v46  ;;  %v279_v46 = vperm.slane %v771_v15, 5 }
  0xa4   :  { %v176_v28 = vpop.permute.xlu1 %175 }
  0xa5   :  { %v180_v59 = vmul.f32 %v178_v38, %v176_v28  ;;  %v181_v60 = vmul.f32 %v179_v54, %v176_v28  ;;  %v246_v47 = vpop.permute.xlu0 %245 }
  0xa6   :  { %v250_v54 = vmul.f32 %v248_v45, %v246_v47  ;;  %v251_v55 = vmul.f32 %v249_v42, %v246_v47 }
  0xa7   :  { %v182_v4 = vadd.f32 %v180_v59, %v172_v63  ;;  %v183_v5 = vadd.f32 %v181_v60, %v173_v0  ;;  %v269_v59 = vperm.slane %v771_v15, 4 }
  0xa9   :  { %v761_v3 = vpop.permute.xlu2 %265  ;;  %v192_v16 = vadd.f32 %v190_v10, %v182_v4  ;;  %v193_v17 = vadd.f32 %v191_v11, %v183_v5  ;;  %v54_v4 = vld [vmem:[#allocation2 + $0x30] sm:$0xff]  ;;  %v55_v5 = vld [vmem:[#allocation2 + $0x38] sm:$0xff]  ;;  %v289_v10 = vperm.slane %v771_v15, 6 }
  0xaa   :  { %v270_v6 = vmul.f32 %v268_v58, %v761_v3  ;;  %v271_v7 = vmul.f32 %v269_v59, %v761_v3 }
  0xab   :  { %v202_v1 = vadd.f32 %v200_v18, %v192_v16  ;;  %v203_v28 = vadd.f32 %v201_v19, %v193_v17  ;;  %v795_v16 = vmul.f32 0.0625, %v54_v4  ;;  %v797_v17 = vmul.f32 0.0625, %v55_v5 }
  0xad   :  { %v206_v43 = vpop.permute.xlu1 %205  ;;  %v329_v22 = vperm.slane %v797_v17, 2 }
  0xae   :  { %v210_v20 = vmul.f32 %v208_v12, %v206_v43  ;;  %v211_v24 = vmul.f32 %v209_v13, %v206_v43  ;;  %v296_v3 = vpop.permute.xlu0 %295 }
  0xb0   :  { %v212_v32 = vadd.f32 %v210_v20, %v202_v1  ;;  %v213_v34 = vadd.f32 %v211_v24, %v203_v28  ;;  %v298_v20 = vperm.slane %v769_v14, 7  ;;  %v299_v24 = vperm.slane %v771_v15, 7 }
  0xb1   :  { %v309_v1 = vperm.slane %v797_v17, 0  ;;  %v319_v14 = vperm.slane %v797_v17, 1 }
  0xb2   :  { %v286_v31 = vpop.permute.xlu2 %285  ;;  %v222_v39 = vadd.f32 %v220_v35, %v212_v32  ;;  %v223_v40 = vadd.f32 %v221_v33, %v213_v34  ;;  %v300_v32 = vmul.f32 %v298_v20, %v296_v3  ;;  %v301_v34 = vmul.f32 %v299_v24, %v296_v3 }
  0xb3   :  { %v290_v25 = vmul.f32 %v288_v49, %v286_v31  ;;  %v291_v26 = vmul.f32 %v289_v10, %v286_v31  ;;  %v328_v31 = vperm.slane %v795_v16, 2  ;;  %v368_v3 = vperm.slane %v795_v16, 6 }
  0xb6   :  { %v226_v2 = vpop.permute.xlu1 %225 }
  0xb7   :  { %v230_v36 = vmul.f32 %v228_v29, %v226_v2  ;;  %v231_v37 = vmul.f32 %v229_v30, %v226_v2 }
  0xb9   :  { %v232_v41 = vadd.f32 %v230_v36, %v222_v39  ;;  %v233_v44 = vadd.f32 %v231_v37, %v223_v40  ;;  %v318_v36 = vperm.slane %v795_v16, 1 }
  0xbb   :  { %v316_v52 = vpop.permute.xlu2 %315  ;;  %v242_v53 = vadd.f32 %v240_v48, %v232_v41  ;;  %v243_v38 = vadd.f32 %v241_v23, %v233_v44  ;;  %v385_v41 = vld [vmem:[#allocation5] sm:$0xff]  ;;  %v346_v48 = vpop.permute.xlu0 %345 }
  0xbc   :  { %v320_v45 = vmul.f32 %v318_v36, %v316_v52  ;;  %v321_v42 = vmul.f32 %v319_v14, %v316_v52  ;;  %v392_v23 = vperm.slane %v385_v41, 0  ;;  %v419_v58 = vperm.slane %v385_v41, 6 }
  0xbd   :  { %v252_v60 = vadd.f32 %v250_v54, %v242_v53  ;;  %v253_v61 = vadd.f32 %v251_v55, %v243_v38  ;;  %v405_v53 = vperm.slane %v385_v41, 5  ;;  %v338_v38 = vperm.slane %v795_v16, 3 }
  0xbe   :  { %v339_v54 = vperm.slane %v797_v17, 3  ;;  %v349_v52 = vperm.slane %v797_v17, 4  ;;  %v432_v49 = vperm.slane %v385_v41, 3  ;;  %v433_v10 = vperm.slane %v385_v41, 7 }
  0xbf   :  { %v256_v27 = vpop.permute.xlu1 %255 }
  0xc0   :  { %v260_v56 = vmul.f32 %v258_v50, %v256_v27  ;;  %v261_v57 = vmul.f32 %v259_v51, %v256_v27  ;;  %v308_v27 = vperm.slane %v795_v16, 0  ;;  %v393_v50 = vperm.slane %v385_v41, 4 }
  0xc1   :  { %v404_v51 = vperm.slane %v385_v41, 1 }
  0xc2   :  { %v262_v0 = vadd.f32 %v260_v56, %v252_v60  ;;  %v263_v2 = vadd.f32 %v261_v57, %v253_v61  ;;  %v418_v57 = vperm.slane %v385_v41, 2  ;;  %v348_v61 = vperm.slane %v795_v16, 4 }
  0xc3   :  { %v416_v24 = vpop.permute.xlu0 %415 }
  0xc4   :  { %v336_v11 = vpop.permute.xlu2 %335  ;;  %v272_v12 = vadd.f32 %v270_v6, %v262_v0  ;;  %v273_v13 = vadd.f32 %v271_v7, %v263_v2  ;;  %v408_v0 = vperm.slane %v404_v51, 1  ;;  %v409_v2 = vperm.slane %v405_v53, 1 }
  0xc5   :  { %v340_v4 = vmul.f32 %v338_v38, %v336_v11  ;;  %v341_v5 = vmul.f32 %v339_v54, %v336_v11  ;;  %v358_v6 = vperm.slane %v795_v16, 5  ;;  %v359_v7 = vperm.slane %v797_v17, 5 }
  0xc8   :  { %v276_v43 = vpop.permute.xlu1 %275 }
  0xc9   :  { %v280_v8 = vmul.f32 %v278_v62, %v276_v43  ;;  %v281_v9 = vmul.f32 %v279_v46, %v276_v43  ;;  %v396_v62 = vperm.slane %v392_v23, 0  ;;  %v397_v46 = vperm.slane %v393_v50, 0 }
  0xcb   :  { %v282_v18 = vadd.f32 %v280_v8, %v272_v12  ;;  %v283_v19 = vadd.f32 %v281_v9, %v273_v13  ;;  %v422_v8 = vperm.slane %v418_v57, 2  ;;  %v423_v9 = vperm.slane %v419_v58, 2 }
  0xcd   :  { %v292_v29 = vadd.f32 %v290_v25, %v282_v18  ;;  %v293_v30 = vadd.f32 %v291_v26, %v283_v19  ;;  %v389_v37 = vpop.permute.xlu2 %388  ;;  %v350_v18 = vmul.f32 %v348_v61, %v346_v48  ;;  %v351_v19 = vmul.f32 %v349_v52, %v346_v48 }
  0xce   :  { %v369_v25 = vperm.slane %v797_v17, 6 }
  0xcf   :  { %v302_v15 = vadd.f32 %v300_v32, %v292_v29  ;;  %v303_v21 = vadd.f32 %v301_v34, %v293_v30  ;;  %v424_v30 = vmul.f32 %v422_v8, %v416_v24  ;;  %v425_v32 = vmul.f32 %v423_v9, %v416_v24 }
  0xd0   :  { %v436_v34 = vperm.slane %v432_v49, 3 }
  0xd1   :  { %v306_v63 = vpop.permute.xlu1 %305 }
  0xd2   :  { %v310_v35 = vmul.f32 %v308_v27, %v306_v63  ;;  %v311_v33 = vmul.f32 %v309_v1, %v306_v63  ;;  %v398_v27 = vmul.f32 %v396_v62, %v389_v37  ;;  %v399_v1 = vmul.f32 %v397_v46, %v389_v37 }
  0xd4   :  { %v312_v39 = vadd.f32 %v310_v35, %v302_v15  ;;  %v313_v40 = vadd.f32 %v311_v33, %v303_v21  ;;  %v437_v35 = vperm.slane %v433_v10, 3 }
  0xd6   :  { %v322_v55 = vadd.f32 %v320_v45, %v312_v39  ;;  %v323_v56 = vadd.f32 %v321_v42, %v313_v40  ;;  %v366_v63 = vpop.permute.xlu2 %365 }
  0xd7   :  { %v370_v41 = vmul.f32 %v368_v3, %v366_v63  ;;  %v371_v45 = vmul.f32 %v369_v25, %v366_v63 }
  0xda   :  { %v326_v28 = vpop.permute.xlu1 %325 }
  0xdb   :  { %v330_v43 = vmul.f32 %v328_v31, %v326_v28  ;;  %v331_v47 = vmul.f32 %v329_v22, %v326_v28  ;;  %v378_v31 = vperm.slane %v795_v16, 7  ;;  %v379_v22 = vperm.slane %v797_v17, 7 }
  0xdd   :  { %v332_v59 = vadd.f32 %v330_v43, %v322_v55  ;;  %v333_v60 = vadd.f32 %v331_v47, %v323_v56 }
  0xdf   :  { %v342_v12 = vadd.f32 %v340_v4, %v332_v59  ;;  %v343_v13 = vadd.f32 %v341_v5, %v333_v60  ;;  %v430_v21 = vpop.permute.xlu2 %429 }
  0xe0   :  { %v439_v43 = vmul.f32 %v437_v35, %v430_v21 }
  0xe1   :  { %v352_v33 = vadd.f32 %v350_v18, %v342_v12  ;;  %v353_v36 = vadd.f32 %v351_v19, %v343_v13 }
  0xe3   :  { %v356_v44 = vpop.permute.xlu1 %355 }
  0xe4   :  { %v360_v28 = vmul.f32 %v358_v6, %v356_v44  ;;  %v361_v29 = vmul.f32 %v359_v7, %v356_v44  ;;  %v438_v44 = vmul.f32 %v436_v34, %v430_v21 }
  0xe6   :  { %v362_v39 = vadd.f32 %v360_v28, %v352_v33  ;;  %v363_v40 = vadd.f32 %v361_v29, %v353_v36 }
  0xe8   :  { %v372_v48 = vadd.f32 %v370_v41, %v362_v39  ;;  %v373_v23 = vadd.f32 %v371_v45, %v363_v40 }
  0xec   :  { %v402_v20 = vpop.permute.xlu1 %401 }
  0xed   :  { %v410_v26 = vmul.f32 %v408_v0, %v402_v20  ;;  %v411_v11 = vmul.f32 %v409_v2, %v402_v20 }
  0xef   :  { %v412_v14 = vadd.f32 %v410_v26, %v398_v27  ;;  %v413_v15 = vadd.f32 %v411_v11, %v399_v1 }
  0xf1   :  { %v426_v37 = vadd.f32 %v424_v30, %v412_v14  ;;  %v427_v42 = vadd.f32 %v425_v32, %v413_v15 }
  0xf3   :  { %v440_v53 = vadd.f32 %v438_v44, %v426_v37  ;;  %v441_v38 = vadd.f32 %v439_v43, %v427_v42 }
  0xf5   :  { %v376_v47 = vpop.permute.xlu1 %375 }
  0xf6   :  { %v380_v50 = vmul.f32 %v378_v31, %v376_v47  ;;  %v381_v51 = vmul.f32 %v379_v22, %v376_v47 }
  0xf8   :  { %v382_v54 = vadd.f32 %v380_v50, %v372_v48  ;;  %v383_v55 = vadd.f32 %v381_v51, %v373_v23 }
  0xfa   :  { %v442_v16 = vmul.f32 %v440_v53, %v382_v54  ;;  %v443_v17 = vmul.f32 %v441_v38, %v383_v55 }
  0xfc   :  { %444 = vst [vmem:[#allocation7] sm:$0xff] %v442_v16 }
  0xfd   :  { %445 = vst [vmem:[#allocation7 + $0x8] sm:$0xff] %v443_v17 }
  0xfe   :  { %456 = dma.vmem_to_hbm [thread:$0]  %s452_s28, 256, %s454_s5, [#allocation4]  }
  0xff   :  { %614 = dma.done.wait [#allocation4], 256  }
 0x100   :  { %615 = vsyncadd [#allocation4], 4294967040 }
 0x101   :  { %461 = vsyncpa [#allocation3], 1 }
 0x102   :  { %462 = vsyncpa [#allocation6], 1 }
 0x103   :  { %463 = vsyncpa [#allocation4], 1 }

</bundles_post_ra>
